<compile_context>
chip_gen: v7x
topology: tpu7x:2x2x1
jax: 0.10.0
libtpu: 0.0.40
codegen_flags: <defaults>
</compile_context>

<pallas_src>
import jax
import jax.numpy as jnp
from jax.experimental import pallas as pl
from jax.experimental.pallas import tpu as pltpu


# ----------------------------- kernels --------------------------------------

def _normalize(w, ksum):
    """Per-q K-segment normalization of w (TD, QK) using the block-diagonal
    0/1 matrix ksum (QK, QK) on the MXU, approx-reciprocal + Newton on VPU."""
    gsum = jnp.dot(w, ksum, preferred_element_type=jnp.float32,
                   precision=jax.lax.Precision.HIGHEST)
    inv_g = pl.reciprocal(gsum, approx=True)
    inv_g = inv_g * (2.0 - gsum * inv_g)   # Newton step 1 (VALU)
    inv_g = inv_g * (2.0 - gsum * inv_g)   # Newton step 2 (VALU)
    return w * inv_g


def _weight_func_var_kernel(xm_ref, xv_ref, c_ref, ls_ref, osl_ref, ksum_ref,
                            qmean_ref, qvar_ref, w_ref):
    # xm_ref, xv_ref : (B, QK) resident; c/ls/osl : (TD, QK); ksum : (QK, QK)
    # outputs : (TD, QK) per (b, d) grid step
    b = pl.program_id(1)
    xm = xm_ref[pl.ds(b, 1), :]              # (1, QK)
    xv = xv_ref[pl.ds(b, 1), :]              # (1, QK)
    c = c_ref[...]                           # (TD, QK)
    ls = ls_ref[...]
    osl = osl_ref[...]                       # outputscale * sqrt(lengthscale)

    var_sum = xv + ls                        # (TD, QK)
    r = jax.lax.rsqrt(var_sum)               # single EUP op
    r = r * (1.5 - 0.5 * var_sum * r * r)    # Newton refinement (VALU), robustness
    inv = r * r                              # 1 / var_sum

    qmean_ref[...] = ((xm * ls + xv * c) * inv).astype(qmean_ref.dtype)
    qvar_ref[...] = ((xv * ls) * inv).astype(qvar_ref.dtype)

    diff = xm - c
    w = osl * r * jnp.exp(diff * diff * (-0.5 * inv))
    w_ref[...] = _normalize(w, ksum_ref[...]).astype(w_ref.dtype)


def _weight_func_novar_kernel(xm_ref, c_ref, nhil_ref, os_ref, ksum_ref, w_ref):
    b = pl.program_id(1)
    xm = xm_ref[pl.ds(b, 1), :]              # (1, QK)
    c = c_ref[...]                           # (TD, QK)
    diff = xm - c
    w = jnp.exp(diff * diff * nhil_ref[...]) * os_ref[...]   # nhil = -0.5/ls (precomputed)
    w_ref[...] = _normalize(w, ksum_ref[...]).astype(w_ref.dtype)


# ----------------------------- sizing helpers --------------------------------

def _vmem_capacity_bytes():
    try:
        return int(pltpu.get_tpu_info().vmem_capacity_bytes)
    except Exception:
        return 64 * 1024 * 1024   # conservative (v7x) fallback


def _pick_td(D, QK, n_params, n_outs, out_itemsize, budget_bytes):
    """Rows of D per block such that the double-buffered (TD, QK) param +
    output tiles fit the VMEM budget.  Returns D itself if it fits, otherwise
    a multiple of 8 (a divisor of D is preferred to avoid a ragged tail)."""
    per_row = 2 * QK * (n_params * 4 + n_outs * out_itemsize)
    td_max = max(1, budget_bytes // per_row)
    if D <= td_max:
        return D
    td_max = max(8, (td_max // 8) * 8)
    for cand in range(td_max, 7, -8):
        if D % cand == 0:
            return cand
    return td_max   # non-divisor: pl.cdiv grid, edge block masked by Pallas


# ----------------------------- wrapper ---------------------------------------

def weight_func_forward(center, raw_outputscale, raw_lengthscale, x_mean,
                        x_var=None, out_dtype=jnp.float32):
    """Pallas implementation of WeightFunc.forward.

    center, raw_outputscale, raw_lengthscale : [D, Q, K]
    x_mean, x_var : [B, Q]
    returns (q_mean, q_var, weight); weight/q_var/q_mean are [B, D, Q, K]
    (out_dtype).  In the x_var=None path q_mean is x_mean unsqueezed to
    [B, 1, Q, 1] (matching the PyTorch module) and q_var is None.
    """
    D, Q, K = center.shape
    B = x_mean.shape[0]
    QK = Q * K
    f32 = jnp.float32
    out_itemsize = jnp.dtype(out_dtype).itemsize

    # softplus(raw) + 1e-6 parameter "properties" — cheap glue in plain JAX.
    lengthscale = (jax.nn.softplus(raw_lengthscale.astype(f32)) + 1e-6).reshape(D, QK)
    outputscale = (jax.nn.softplus(raw_outputscale.astype(f32)) + 1e-6).reshape(D, QK)
    center_f = center.astype(f32).reshape(D, QK)

    # Fold (Q, K) -> QK lanes: x_mean[b, q] lives at lane q*K + k for every k.
    xm_rep = jnp.repeat(x_mean.astype(f32), K, axis=-1)          # [B, QK]

    # Block-diagonal segmented-sum matrix S[i, j] = 1 iff i//K == j//K.
    grp = jnp.arange(QK) // K
    ksum = (grp[:, None] == grp[None, :]).astype(f32)            # [QK, QK]

    n_outs = 3 if x_var is not None else 1
    cap = _vmem_capacity_bytes()
    budget = max(8 << 20, cap // 2 - (8 << 20))
    TD = _pick_td(D, QK, n_params=3, n_outs=n_outs,
                  out_itemsize=out_itemsize, budget_bytes=budget)
    n_db = pl.cdiv(D, TD)
    grid = (n_db, B)   # B innermost: (TD,QK) param tiles reused across the whole B sweep

    param_spec = pl.BlockSpec((TD, QK), lambda d, b: (d, 0))
    xfull_spec = pl.BlockSpec((B, QK), lambda d, b: (0, 0))      # resident, DMA'd once
    ksum_spec = pl.BlockSpec((QK, QK), lambda d, b: (0, 0))      # resident, DMA'd once
    out_spec = pl.BlockSpec((None, TD, QK), lambda d, b: (b, d, 0))   # B dim squeezed
    out_sds = jax.ShapeDtypeStruct((B, D, QK), out_dtype)

    # Right-sized VMEM limit: double-buffered param/out tiles + resident x/ksum.
    footprint = (2 * QK * TD * (3 * 4 + n_outs * out_itemsize)
                 + 2 * (2 if x_var is not None else 1) * B * QK * 4
                 + 2 * QK * QK * 4)
    vmem_limit = int(max(32 << 20, min(cap - (16 << 20), footprint + (16 << 20))))

    cparams = pltpu.CompilerParams(
        dimension_semantics=("parallel", "parallel"),   # disjoint (b, d) slabs
        vmem_limit_bytes=vmem_limit,
    )

    if x_var is not None:
        xv_rep = jnp.repeat(x_var.astype(f32), K, axis=-1)       # [B, QK]
        os_sqrt_ls = outputscale * jnp.sqrt(lengthscale)         # folded prefactor
        q_mean, q_var, weight = pl.pallas_call(
            _weight_func_var_kernel,
            out_shape=(out_sds, out_sds, out_sds),
            grid_spec=pltpu.PrefetchScalarGridSpec(
                num_scalar_prefetch=0,
                grid=grid,
                in_specs=[xfull_spec, xfull_spec, param_spec, param_spec,
                          param_spec, ksum_spec],
                out_specs=[out_spec, out_spec, out_spec],
            ),
            compiler_params=cparams,
        )(xm_rep, xv_rep, center_f, lengthscale, os_sqrt_ls, ksum)
        return (q_mean.reshape(B, D, Q, K),
                q_var.reshape(B, D, Q, K),
                weight.reshape(B, D, Q, K))
    else:
        neg_half_inv_ls = -0.5 / lengthscale                     # hoisted to XLA
        weight = pl.pallas_call(
            _weight_func_novar_kernel,
            out_shape=out_sds,
            grid_spec=pltpu.PrefetchScalarGridSpec(
                num_scalar_prefetch=0,
                grid=grid,
                in_specs=[xfull_spec, param_spec, param_spec, param_spec, ksum_spec],
                out_specs=out_spec,
            ),
            compiler_params=cparams,
        )(xm_rep, center_f, neg_half_inv_ls, outputscale, ksum)
        # PyTorch returns the unsqueezed x_mean; do not materialize a [B,D,Q,K] copy.
        q_mean = x_mean.astype(f32)[:, None, :, None]            # [B, 1, Q, 1]
        return q_mean, None, weight.reshape(B, D, Q, K)


# ----------------------------- reference (pure JAX) ---------------------------

def _reference(center, raw_os, raw_ls, x_mean, x_var):
    outputscale = jax.nn.softplus(raw_os) + 1e-6
    lengthscale = jax.nn.softplus(raw_ls) + 1e-6
    xm = x_mean[:, None, :, None]                                 # [B, 1, Q, 1]
    if x_var is not None:
        xv = x_var[:, None, :, None]
        cross = xm * lengthscale + xv * center
        var_sum = xv + lengthscale
        q_mean = cross / var_sum
        q_var = xv * lengthscale / var_sum
        diff = xm - center
        se = jnp.sqrt(lengthscale / var_sum) * jnp.exp(-diff**2 / (2.0 * var_sum))
    else:
        q_mean = xm
        q_var = None
        diff = xm - center
        se = jnp.exp(-diff**2 / (2.0 * lengthscale))
    w = se * outputscale
    w = w / jnp.sum(w, axis=-1, keepdims=True)
    return q_mean, q_var, w


# ----------------------------- main -------------------------------------------

if __name__ == "__main__":
    B, D, Q, K = 2, 4, 8, 16

    # Parameter init matching WeightFunc.__init__ (softplus-inverse of 1 and 1/K^2).
    raw_outputscale = jnp.full((D, Q, K), jnp.log(jnp.expm1(1.0)), dtype=jnp.float32)
    raw_lengthscale = jnp.full((D, Q, K), jnp.log(jnp.expm1(1.0 / (K ** 2))),
                               dtype=jnp.float32)

    key = jax.random.PRNGKey(0)
    k1, k2, k3 = jax.random.split(key, 3)
    # Keep centers / inputs in a compact range: with the tiny 1/K^2 lengthscale
    # init, widely spread inputs make every SE term underflow and the 0/0
    # normalization produces NaN in BOTH kernel and reference (module semantics).
    center = 0.2 * jax.random.normal(k1, (D, Q, K), dtype=jnp.float32)
    x_mean = 0.2 * jax.random.normal(k2, (B, Q), dtype=jnp.float32)
    x_var = jax.nn.softplus(jax.random.normal(k3, (B, Q), dtype=jnp.float32)) + 1e-3

    # --- path with x_var (f32 outputs) ---
    q_mean, q_var, weight = weight_func_forward(
        center, raw_outputscale, raw_lengthscale, x_mean, x_var)
    jax.block_until_ready((q_mean, q_var, weight))

    qm_ref, qv_ref, w_ref = _reference(center, raw_outputscale, raw_lengthscale,
                                       x_mean, x_var)
    assert q_mean.shape == (B, D, Q, K)
    assert jnp.allclose(q_mean, qm_ref, atol=1e-5, rtol=1e-5)
    assert jnp.allclose(q_var, qv_ref, atol=1e-5, rtol=1e-5)
    assert jnp.allclose(weight, w_ref, atol=1e-5, rtol=1e-5)

    # --- path without x_var (f32 outputs) ---
    q_mean2, q_var2, weight2 = weight_func_forward(
        center, raw_outputscale, raw_lengthscale, x_mean, None)
    jax.block_until_ready((q_mean2, weight2))
    qm_ref2, _, w_ref2 = _reference(center, raw_outputscale, raw_lengthscale,
                                    x_mean, None)
    assert q_var2 is None
    assert q_mean2.shape == (B, 1, Q, 1)
    assert jnp.allclose(q_mean2, qm_ref2, atol=1e-5, rtol=1e-5)
    assert jnp.allclose(weight2, w_ref2, atol=1e-5, rtol=1e-5)

    # --- bf16-output smoke test (mem-bound fast path, looser tolerance) ---
    qm_bf, qv_bf, w_bf = weight_func_forward(
        center, raw_outputscale, raw_lengthscale, x_mean, x_var,
        out_dtype=jnp.bfloat16)
    jax.block_until_ready((qm_bf, qv_bf, w_bf))
    assert w_bf.dtype == jnp.bfloat16
    assert jnp.allclose(w_bf.astype(jnp.float32), w_ref, atol=2e-2, rtol=2e-2)
    assert jnp.allclose(qm_bf.astype(jnp.float32), qm_ref, atol=2e-2, rtol=2e-2)

    print("KERNEL_OK")
</pallas_src>

<mosaic_0001>
module attributes {stable_mosaic.version = 11 : i64} {
  func.func @_weight_func_var_kernel(%arg0: i32, %arg1: i32, %arg2: memref<2x128xf32, #tpu.memory_space<vmem>>, %arg3: memref<2x128xf32, #tpu.memory_space<vmem>>, %arg4: memref<4x128xf32, #tpu.memory_space<vmem>>, %arg5: memref<4x128xf32, #tpu.memory_space<vmem>>, %arg6: memref<4x128xf32, #tpu.memory_space<vmem>>, %arg7: memref<128x128xf32, #tpu.memory_space<vmem>>, %arg8: memref<1x4x128xf32, #tpu.memory_space<vmem>>, %arg9: memref<1x4x128xf32, #tpu.memory_space<vmem>>, %arg10: memref<1x4x128xf32, #tpu.memory_space<vmem>>) attributes {dimension_semantics = [#tpu.dimension_semantics<parallel>, #tpu.dimension_semantics<parallel>], iteration_bounds = array<i64: 1, 2>, scalar_prefetch = 0 : i64, scratch_operands = 0 : i64, tpu.core_type = #tpu.core_type<tc>, window_params = [{pipeline_mode = #tpu.pipeline_mode<synchronous>, transform_indices = @transform_0, window_bounds = array<i64: 2, 128>}, {pipeline_mode = #tpu.pipeline_mode<synchronous>, transform_indices = @transform_1, window_bounds = array<i64: 2, 128>}, {transform_indices = @transform_2, window_bounds = array<i64: 4, 128>}, {transform_indices = @transform_3, window_bounds = array<i64: 4, 128>}, {transform_indices = @transform_4, window_bounds = array<i64: 4, 128>}, {pipeline_mode = #tpu.pipeline_mode<synchronous>, transform_indices = @transform_5, window_bounds = array<i64: 128, 128>}, {transform_indices = @transform_6, window_bounds = array<i64: 1, 4, 128>}, {transform_indices = @transform_7, window_bounds = array<i64: 1, 4, 128>}, {transform_indices = @transform_8, window_bounds = array<i64: 1, 4, 128>}]} {
    %0 = arith.index_cast %arg1 : i32 to index
    %c0 = arith.constant 0 : index
    %1 = vector.load %arg2[%0, %c0] : memref<2x128xf32, #tpu.memory_space<vmem>>, vector<1x128xf32>
    %2 = arith.index_cast %arg1 : i32 to index
    %c0_0 = arith.constant 0 : index
    %3 = vector.load %arg3[%2, %c0_0] : memref<2x128xf32, #tpu.memory_space<vmem>>, vector<1x128xf32>
    %c0_1 = arith.constant 0 : index
    %c0_2 = arith.constant 0 : index
    %4 = vector.load %arg4[%c0_1, %c0_2] : memref<4x128xf32, #tpu.memory_space<vmem>>, vector<4x128xf32>
    %c0_3 = arith.constant 0 : index
    %c0_4 = arith.constant 0 : index
    %5 = vector.load %arg5[%c0_3, %c0_4] : memref<4x128xf32, #tpu.memory_space<vmem>>, vector<4x128xf32>
    %c0_5 = arith.constant 0 : index
    %c0_6 = arith.constant 0 : index
    %6 = vector.load %arg6[%c0_5, %c0_6] : memref<4x128xf32, #tpu.memory_space<vmem>>, vector<4x128xf32>
    %7 = vector.broadcast %3 : vector<1x128xf32> to vector<4x128xf32>
    %8 = arith.addf %7, %5 : vector<4x128xf32>
    %9 = math.rsqrt %8 : vector<4x128xf32>
    %cst = arith.constant 5.000000e-01 : f32
    %10 = vector.broadcast %cst : f32 to vector<4x128xf32>
    %11 = arith.mulf %10, %8 : vector<4x128xf32>
    %12 = arith.mulf %11, %9 : vector<4x128xf32>
    %13 = arith.mulf %12, %9 : vector<4x128xf32>
    %cst_7 = arith.constant 1.500000e+00 : f32
    %14 = vector.broadcast %cst_7 : f32 to vector<4x128xf32>
    %15 = arith.subf %14, %13 : vector<4x128xf32>
    %16 = arith.mulf %9, %15 : vector<4x128xf32>
    %17 = arith.mulf %16, %16 : vector<4x128xf32>
    %18 = vector.broadcast %1 : vector<1x128xf32> to vector<4x128xf32>
    %19 = arith.mulf %18, %5 : vector<4x128xf32>
    %20 = vector.broadcast %3 : vector<1x128xf32> to vector<4x128xf32>
    %21 = arith.mulf %20, %4 : vector<4x128xf32>
    %22 = arith.addf %19, %21 : vector<4x128xf32>
    %23 = arith.mulf %22, %17 : vector<4x128xf32>
    %c0_8 = arith.constant 0 : index
    %c0_9 = arith.constant 0 : index
    %c0_10 = arith.constant 0 : index
    %24 = vector.load %arg8[%c0_8, %c0_9, %c0_10] : memref<1x4x128xf32, #tpu.memory_space<vmem>>, vector<1x4x128xf32>
    %25 = vector.shape_cast %24 : vector<1x4x128xf32> to vector<4x128xf32>
    %26 = vector.shape_cast %23 : vector<4x128xf32> to vector<1x4x128xf32>
    tpu.vector_store %arg8[%c0_8, %c0_9, %c0_10], %26 {strides = array<i32>} : memref<1x4x128xf32, #tpu.memory_space<vmem>>, vector<1x4x128xf32>,
    %27 = vector.broadcast %3 : vector<1x128xf32> to vector<4x128xf32>
    %28 = arith.mulf %27, %5 : vector<4x128xf32>
    %29 = arith.mulf %28, %17 : vector<4x128xf32>
    %c0_11 = arith.constant 0 : index
    %c0_12 = arith.constant 0 : index
    %c0_13 = arith.constant 0 : index
    %30 = vector.load %arg9[%c0_11, %c0_12, %c0_13] : memref<1x4x128xf32, #tpu.memory_space<vmem>>, vector<1x4x128xf32>
    %31 = vector.shape_cast %30 : vector<1x4x128xf32> to vector<4x128xf32>
    %32 = vector.shape_cast %29 : vector<4x128xf32> to vector<1x4x128xf32>
    tpu.vector_store %arg9[%c0_11, %c0_12, %c0_13], %32 {strides = array<i32>} : memref<1x4x128xf32, #tpu.memory_space<vmem>>, vector<1x4x128xf32>,
    %33 = vector.broadcast %1 : vector<1x128xf32> to vector<4x128xf32>
    %34 = arith.subf %33, %4 : vector<4x128xf32>
    %35 = arith.mulf %6, %16 : vector<4x128xf32>
    %36 = arith.mulf %34, %34 : vector<4x128xf32>
    %cst_14 = arith.constant -5.000000e-01 : f32
    %37 = vector.broadcast %cst_14 : f32 to vector<4x128xf32>
    %38 = arith.mulf %37, %17 : vector<4x128xf32>
    %39 = arith.mulf %36, %38 : vector<4x128xf32>
    %40 = math.exp %39 : vector<4x128xf32>
    %41 = arith.mulf %35, %40 : vector<4x128xf32>
    %c0_15 = arith.constant 0 : index
    %c0_16 = arith.constant 0 : index
    %42 = vector.load %arg7[%c0_15, %c0_16] : memref<128x128xf32, #tpu.memory_space<vmem>>, vector<128x128xf32>
    %cst_17 = arith.constant dense<0.000000e+00> : vector<4x128xf32>
    %43 = tpu.matmul %41, %42, %cst_17 {dimension_numbers = #tpu.dot_dimension_numbers<[1], [0], [0], [1], [0, 0, 1, 1], [], []>, precision = #tpu.contract_precision<fp32>} : vector<4x128xf32>, vector<128x128xf32>, vector<4x128xf32> -> vector<4x128xf32>
    %44 = tpu.reciprocal %43 {approx = true} : vector<4x128xf32> -> vector<4x128xf32>
    %45 = arith.mulf %43, %44 : vector<4x128xf32>
    %cst_18 = arith.constant 2.000000e+00 : f32
    %46 = vector.broadcast %cst_18 : f32 to vector<4x128xf32>
    %47 = arith.subf %46, %45 : vector<4x128xf32>
    %48 = arith.mulf %44, %47 : vector<4x128xf32>
    %49 = arith.mulf %43, %48 : vector<4x128xf32>
    %cst_19 = arith.constant 2.000000e+00 : f32
    %50 = vector.broadcast %cst_19 : f32 to vector<4x128xf32>
    %51 = arith.subf %50, %49 : vector<4x128xf32>
    %52 = arith.mulf %48, %51 : vector<4x128xf32>
    %53 = arith.mulf %41, %52 : vector<4x128xf32>
    %c0_20 = arith.constant 0 : index
    %c0_21 = arith.constant 0 : index
    %c0_22 = arith.constant 0 : index
    %54 = vector.load %arg10[%c0_20, %c0_21, %c0_22] : memref<1x4x128xf32, #tpu.memory_space<vmem>>, vector<1x4x128xf32>
    %55 = vector.shape_cast %54 : vector<1x4x128xf32> to vector<4x128xf32>
    %56 = vector.shape_cast %53 : vector<4x128xf32> to vector<1x4x128xf32>
    tpu.vector_store %arg10[%c0_20, %c0_21, %c0_22], %56 {strides = array<i32>} : memref<1x4x128xf32, #tpu.memory_space<vmem>>, vector<1x4x128xf32>,
    return
  }
  func.func @transform_0(%arg0: i32, %arg1: i32) -> (i32, i32) {
    %c0_i32 = arith.constant 0 : i32
    %c0_i32_0 = arith.constant 0 : i32
    %c0_i32_1 = arith.constant 0 : i32
    return %c0_i32, %c0_i32_0 : i32, i32
  }
  func.func @transform_1(%arg0: i32, %arg1: i32) -> (i32, i32) {
    %c0_i32 = arith.constant 0 : i32
    %c0_i32_0 = arith.constant 0 : i32
    %c0_i32_1 = arith.constant 0 : i32
    return %c0_i32, %c0_i32_0 : i32, i32
  }
  func.func @transform_2(%arg0: i32, %arg1: i32) -> (i32, i32) {
    %c0_i32 = arith.constant 0 : i32
    %c0_i32_0 = arith.constant 0 : i32
    return %arg0, %c0_i32 : i32, i32
  }
  func.func @transform_3(%arg0: i32, %arg1: i32) -> (i32, i32) {
    %c0_i32 = arith.constant 0 : i32
    %c0_i32_0 = arith.constant 0 : i32
    return %arg0, %c0_i32 : i32, i32
  }
  func.func @transform_4(%arg0: i32, %arg1: i32) -> (i32, i32) {
    %c0_i32 = arith.constant 0 : i32
    %c0_i32_0 = arith.constant 0 : i32
    return %arg0, %c0_i32 : i32, i32
  }
  func.func @transform_5(%arg0: i32, %arg1: i32) -> (i32, i32) {
    %c0_i32 = arith.constant 0 : i32
    %c0_i32_0 = arith.constant 0 : i32
    %c0_i32_1 = arith.constant 0 : i32
    return %c0_i32, %c0_i32_0 : i32, i32
  }
  func.func @transform_6(%arg0: i32, %arg1: i32) -> (i32, i32, i32) {
    %c0_i32 = arith.constant 0 : i32
    %c0_i32_0 = arith.constant 0 : i32
    return %arg1, %arg0, %c0_i32 : i32, i32, i32
  }
  func.func @transform_7(%arg0: i32, %arg1: i32) -> (i32, i32, i32) {
    %c0_i32 = arith.constant 0 : i32
    %c0_i32_0 = arith.constant 0 : i32
    return %arg1, %arg0, %c0_i32 : i32, i32, i32
  }
  func.func @transform_8(%arg0: i32, %arg1: i32) -> (i32, i32, i32) {
    %c0_i32 = arith.constant 0 : i32
    %c0_i32_0 = arith.constant 0 : i32
    return %arg1, %arg0, %c0_i32 : i32, i32, i32
  }
}

</mosaic_0001>

<bundles_post_ra>
// kernel: tpu_custom_call.1
= control target key start
LH: loop header
LB: loop body
LE: loop exit
PB: predicated region body
PF: predicated region fallthrough
CT: control target
= control target key end

     0   :  { %s2804_s0 = inlined_call_operand.hbm [shape: f32[2,128], index: 0, kind: input, shape index: {}]   ;;  %s2805_s1 = inlined_call_operand.vmem [shape: f32[2,128], index: 1, kind: input, shape index: {}]   ;;  %s2806_s2 = inlined_call_operand.vmem [shape: f32[4,128], index: 2, kind: input, shape index: {}]   ;;  %s2807_s3 = inlined_call_operand.vmem [shape: f32[4,128], index: 3, kind: input, shape index: {}]   ;;  %s2808_s4 = inlined_call_operand.vmem [shape: f32[4,128], index: 4, kind: input, shape index: {}]   ;;  %s2809_s5 = inlined_call_operand.hbm [shape: f32[128,128], index: 5, kind: input, shape index: {}]   ;;  %s2810_s6 = inlined_call_operand.hbm [shape: f32[2,4,128], index: 6, kind: output, shape index: {0}]   ;;  %s2811_s7 = inlined_call_operand.hbm [shape: f32[2,4,128], index: 7, kind: output, shape index: {1}]   ;;  %s2812_s8 = inlined_call_operand.hbm [shape: f32[2,4,128], index: 8, kind: output, shape index: {2}]  }
   0x1   :  { %2819 = sst [smem:[#allocation17_spill]] %s2804_s0 }
   0x2   :  { %14 = vsyncpa [#allocation3], 0 }
   0x3   :  { %15 = vsyncpa [#allocation6], 0 }
   0x4   :  { %16 = vsyncpa [#allocation4], 0 }
   0x5   :  { %18 = vsyncpa [#allocation4 + $0x1], 0 }
   0x6   :  { %19 = vsyncpa [#allocation9], 0 }
   0x7   :  { %21 = vsyncpa [#allocation9 + $0x1], 0  ;;  %s2190_s27 = smov 0   ;;  %s2192_s28 = smov 0  }
   0x8   :  { %s2194_s29 = smov 0   ;;  %s2196_s30 = smov 0  }
   0x9   :  { %s2198_s9 = smov 0   ;;  %s2200_s10 = smov 0  }
   0xa LB: > { %2820 = sst [smem:[#allocation15_spill]] %s2129_s9  ;;  %s2221_s11 = sadd.s32 4294967295, %s2133_s10   ;;  %s2133_s10 = sphi %s2200_s10, %s27_s10   ;;  %s2129_s9 = sphi %s2198_s9, %s2836_s9   ;;  %s2125_s30 = sphi %s2196_s30, %s2835_s30   ;;  %s2121_s29 = sphi %s2194_s29, %s2839_s29   ;;  %s2117_s28 = sphi %s2192_s28, %s2838_s28   ;;  %s2113_s27 = sphi %s2190_s27, %s2837_s27  }
   0xb   : > { %s2813_s12 = sadd.s32 4294967294, %s2133_s10   ;;  %s36_s13 = sadd.s32 1, %s2129_s9 }
   0xc   : > { %s189_s14 = sadd.s32 1, %s2121_s29  ;;  %p37_p0 = scmp.ge.s32.totalorder %s36_s13, 2 }
   0xd   : > { %p199_p1 = scmp.ne.s32.totalorder %s2121_s29, %s2117_s28  ;;  %p200_p2 = scmp.eq.s32.totalorder %s2221_s11, 1 }
   0xe   : > { %p205_p3 = scmp.ne.s32.totalorder %s2117_s28, %s2113_s27  ;;  %s2841_s13 = smov (%p37_p0, %s36_s13), 0 }
   0xf   : > { %2821 = sst [smem:[#allocation16_spill]] %s2841_s13  ;;  %p2233_p4 = por %p200_p2, %p199_p1 }
  0x10   : > { %p206_p5 = scmp.eq.s32.totalorder %s2813_s12, 1  ;;  %s184_s16 = ssub.s32 %s2129_s9, %s2841_s13 }
  0x11   : > { %s2822_s15 = scalar_select %p2233_p4, 1, 0 }
  0x12   : > { %p1347_p6 = scmp.ge.s32.totalorder %s2133_s10, 1  ;;  %p187_p7 = scmp.eq.s32.totalorder %s184_s16, 0 }
  0x13   : > { %p2242_p8 = por %p206_p5, %p205_p3  ;;  %p269_p9 = scmp.lt.s32.totalorder %s2133_s10, 3 }
  0x14   : > { %s2248_s18 = scalar_select %p187_p7, %s2121_s29, %s189_s14  }
  0x15   : > { %s2823_s17 = scalar_select %p2242_p8, 1, 0 }
  0x16   : > { %p2250_p10 = pnand %p1347_p6, %p269_p9  ;;  %p2815_p11 = scmp.eq.s32.totalorder %s2221_s11, 0 }
  0x17   : > { %s2135_s20 = smov [#allocation2]   ;;  %s2136_s22 = smov [#allocation5]  }
  0x18   : > { %s2824_s19 = scalar_select %p2250_p10, 1, 0 }
  0x19   : > { %p1848_p12 = pneg %p2250_p10  ;;  %s282_s21 = sshll.u32 %s2135_s20, 4  ;;  %s283_s21 = int_to_ptr.vmem [resolvable:$true] %s282_s21 }
  0x1a   : > { %s316_s23 = sshll.u32 %s2136_s22, 4  ;;  %s2826_s0 = sld [smem:[#allocation17_spill]]  ;;  %s2263_s23 = int_to_ptr.vmem [resolvable:$true] %s316_s23 }
  0x1b   : > { %p2259_p13 = pnand %p2815_p11, %p1848_p12 }
  0x1d   : > { %p1933_p1 = pneg %p2259_p13 }
  0x20   : > { %s1931_s14 = scalar_lea.hbm %s2826_s0, 32 }
  0x21   : > { %p1932_p0 = scmp.ne.s32.totalorder %s2826_s0, %s1931_s14  ;;  %p1938_p5 = scmp.lt.u32.totalorder %s1931_s14, %s2826_s0 }
  0x23   : > { %p1934_p2 = pnand %p1933_p1, %p1932_p0 }
  0x25   : > { %p1935_p3 = pneg %p1934_p2 }
  0x27   : > { %p1940_p6 = pnand %p1938_p5, %p1935_p3 }
  0x29   : > { %1943 = shalt.err (!%p1940_p6)
}
  0x2a   : > { %s1944_s13 = scalar_lea.vmem %s283_s21, 32  ;;  %p1952_p11 = scmp.lt.s32.totalorder %s283_s21, %s283_s21 }
  0x2b   : > { %p1945_p7 = scmp.ne.s32.totalorder %s283_s21, %s1944_s13  ;;  %p1953_p8 = scmp.lt.s32.totalorder %s1944_s13, %s1944_s13 }
  0x2d   : > { %p1947_p9 = pnand %p1945_p7, %p1933_p1  ;;  %p1954_p4 = por %p1953_p8, %p1952_p11 }
  0x2f   : > { %p1948_p12 = pneg %p1947_p9 }
  0x31   : > { %p1955_p10 = pnand %p1954_p4, %p1948_p12 }
  0x33   : > { %1958 = shalt.err (!%p1955_p10)
}
  0x34   : > { %1851 = dma.hbm_to_vmem [thread:$0]  (!%p2259_p13), %s2826_s0, 32, %s283_s21, [#allocation3]  }
  0x35   : > { %s1959_s16 = scalar_lea.hbm %s2809_s5, 2048 }
  0x36   : > { %p1960_p0 = scmp.ne.s32.totalorder %s2809_s5, %s1959_s16  ;;  %p1966_p10 = scmp.lt.u32.totalorder %s1959_s16, %s2809_s5 }
  0x38   : > { %p1962_p8 = pnand %p1960_p0, %p1933_p1 }
  0x3a   : > { %p1963_p4 = pneg %p1962_p8 }
  0x3c   : > { %p1968_p11 = pnand %p1966_p10, %p1963_p4 }
  0x3e   : > { %1971 = shalt.err (!%p1968_p11)
}
  0x3f   : > { %s1972_s21 = scalar_lea.vmem %s2263_s23, 2048  ;;  %p1980_p6 = scmp.lt.s32.totalorder %s2263_s23, %s2263_s23 }
  0x40   : > { %p1973_p2 = scmp.ne.s32.totalorder %s2263_s23, %s1972_s21  ;;  %p1981_p7 = scmp.lt.s32.totalorder %s1972_s21, %s1972_s21 }
  0x42   : > { %p1975_p3 = pnand %p1973_p2, %p1933_p1  ;;  %p1982_p9 = por %p1981_p7, %p1980_p6 }
  0x44   : > { %p1976_p5 = pneg %p1975_p3 }
  0x46   : > { %p1983_p12 = pnand %p1982_p9, %p1976_p5 }
  0x48   : > { %1986 = shalt.err (!%p1983_p12)
}
  0x49   : > { %s2137_s9 = smov 128   ;;  %s2138_s12 = smov 8  }
  0x4a   : > { %1854 = dma.hbm_to_vmem [thread:$0]  (!%p2259_p13), %s2809_s5, 2048, %s2263_s23, [#allocation6], %s2137_s9, %s2137_s9, %s2138_s12  }
  0x4b   : > { %p2827_p0 = scmp.ne.s32.totalorder %s2824_s19, 0 }
  0x4c   : > { %p2828_p1 = scmp.eq.s32.totalorder (!%p2827_p0), %s2221_s11, 0 }
  0x4d   : > { %332 = sbr.rel (%p2827_p0) target bundleno = 462 (0x1ce), region = 44 }
  0x54   : > { %2096 = dma.done.wait (%p2828_p1), [#allocation3], 32   ;;  %p2829_p8 = pmov %p2828_p1 }
  0x55   : > { %p2830_p4 = pmov %p2828_p1 }
  0x56   : > { %2098 = vsyncadd (%p2829_p8), [#allocation3], 4294967264 }
  0x57   : > { %2100 = dma.done.wait (%p2830_p4), [#allocation6], 2048   ;;  %p2831_p10 = pmov %p2828_p1 }
  0x58   : > { %v2139_v0 = vmov 0.0|0.0   ;;  %vm2140_vm0 = vmmov 0   ;;  %v2141_v1 = vmov 0.0   ;;  %v2328_v2 = vld [vmem:[#allocation5] sm:$0xff]  ;;  %v2330_v3 = vld [vmem:[#allocation5 + $0x8] sm:$0xff]  ;;  %v2332_v4 = vld [vmem:[#allocation5 + $0x10] sm:$0xff]  ;;  %s401_s24 = scalar_lea.vmem %s2805_s1, %s2125_s30 }
  0x59   : > { %2102 = vsyncadd (%p2831_p10), [#allocation6], 4294965248  ;;  %1753 = vmatprep.subr.bf16.mxu0 %v2139_v0  ;;  %1681 = vmatprep.subr.bf16.mxu1 %v2139_v0  ;;  %v455_v5 = vand.u32 4294901760, %v2328_v2  ;;  %v458_v6 = vand.u32 4294901760, %v2330_v3  ;;  %v2336_v7 = vld [vmem:[#allocation5 + $0x18] sm:$0xff]  ;;  %v461_v8 = vand.u32 4294901760, %v2332_v4 }
  0x5a   : > { %1608 = vmatprep.mubr.msk.f32.mxu0 %vm2140_vm0, %v2141_v1  ;;  %1503 = vmatprep.mubr.msk.f32.mxu1 %vm2140_vm0, %v2141_v1  ;;  %v464_v9 = vand.u32 4294901760, %v2336_v7  ;;  %v2340_v10 = vld [vmem:[#allocation5 + $0x20] sm:$0xff]  ;;  %v2342_v11 = vld [vmem:[#allocation5 + $0x28] sm:$0xff]  ;;  %v2366_v16 = vld [vmem:[#allocation5 + $0x30] sm:$0xff]  ;;  %s399_s20 = scalar_lea.vmem [#allocation2], %s2125_s30  ;;  %s370_s12 = sand.u32 1, %s2117_s28  }
  0x5b   : > { %v2348_v12 = vpack.c.bf16 %v458_v6, %v455_v5  ;;  %v467_v14 = vand.u32 4294901760, %v2340_v10  ;;  %v470_v15 = vand.u32 4294901760, %v2342_v11  ;;  %v2368_v17 = vld [vmem:[#allocation5 + $0x38] sm:$0xff]  ;;  %v2370_v18 = vld [vmem:[%s401_s24] ss:$0 sm:$0xff]  ;;  %v473_v21 = vand.u32 4294901760, %v2366_v16 }
  0x5c   : > { %v2360_v13 = vpack.c.bf16 %v464_v9, %v461_v8  ;;  %v2375_v19 = vld [vmem:[%s2807_s3] sm:$0xf]  ;;  %v476_v22 = vand.u32 4294901760, %v2368_v17  ;;  %v2407_v29 = vld [vmem:[#allocation5 + $0x50] sm:$0xff]  ;;  %v2409_v30 = vld [vmem:[#allocation5 + $0x58] sm:$0xff]  ;;  %v2485_v59 = vsub.f32 %v2328_v2, %v455_v5  ;;  %v2490_v60 = vsub.f32 %v2330_v3, %v458_v6  ;;  %s2683_s25 = sshll.u32 %s370_s12, 2 }
  0x5d   : > { %1755 = vmatpush3.bf16.msra.mxu0 %v2348_v12  ;;  %1683 = vmatpush3.bf16.msra.mxu1 %v2348_v12  ;;  %v2383_v20 = vpack.c.bf16 %v470_v15, %v467_v14  ;;  %v2389_v23 = vld [vmem:[#allocation5 + $0x40] sm:$0xff]  ;;  %v2391_v24 = vld [vmem:[#allocation5 + $0x48] sm:$0xff]  ;;  %v410_v25 = vadd.f32 %v2370_v18, %v2375_v19  ;;  %v485_v32 = vand.u32 4294901760, %v2407_v29  ;;  %v488_v33 = vand.u32 4294901760, %v2409_v30  ;;  %v2439_v41 = vld [vmem:[#allocation5 + $0x70] sm:$0xff]  ;;  %s1109_s26 = sand.u32 1, %s2221_s11  }
  0x5e   : > { %1756 = vmatprep.subr.bf16.mxu0 %v2139_v0  ;;  %1684 = vmatprep.subr.bf16.mxu1 %v2139_v0  ;;  %v2401_v26 = vpack.c.bf16 %v476_v22, %v473_v21  ;;  %v479_v27 = vand.u32 4294901760, %v2389_v23  ;;  %v482_v28 = vand.u32 4294901760, %v2391_v24  ;;  %v2423_v34 = vld [vmem:[#allocation5 + $0x60] sm:$0xff]  ;;  %v2425_v35 = vld [vmem:[#allocation5 + $0x68] sm:$0xff]  ;;  %v2441_v42 = vld [vmem:[#allocation5 + $0x78] sm:$0xff]  ;;  %v497_v47 = vand.u32 4294901760, %v2439_v41 }
  0x5f   : > { %1925 = vrsqrt.f32 %v410_v25  ;;  %v412_v36 = vmul.f32 0.5, %v410_v25  ;;  %v2433_v37 = vpack.c.bf16 %v488_v33, %v485_v32  ;;  %v491_v38 = vand.u32 4294901760, %v2423_v34  ;;  %v2444_v44 = vld [vmem:[%s399_s20] ss:$0 sm:$0xff]  ;;  %s2688_s19 = sshll.u32 %s2125_s30, 6  ;;  %s379_s23 = scalar_lea.vmem [#allocation8], %s2683_s25 }
  0x60   : > { %v2417_v31 = vpack.c.bf16 %v482_v28, %v479_v27  ;;  %v494_v39 = vand.u32 4294901760, %v2425_v35  ;;  %v2449_v45 = vld [vmem:[%s2806_s2] sm:$0xf]  ;;  %v500_v48 = vand.u32 4294901760, %v2441_v42  ;;  %v2498_v63 = vsub.f32 %v2332_v4, %v461_v8  ;;  %s2696_s16 = scalar_lea.hbm %s2811_s7, %s2688_s19  ;;  %s1143_s20 = sshll.u32 %s379_s23, 4  ;;  %s2698_s20 = int_to_ptr.vmem [resolvable:$true] %s1143_s20 }
  0x61   : > { %1758 = vmatpush3.bf16.msra.mxu0 %v2360_v13  ;;  %1686 = vmatpush3.bf16.msra.mxu1 %v2360_v13  ;;  %v430_v51 = vsub.f32 %v2444_v44, %v2449_v45  ;;  %v405_v61 = vld [vmem:[%s2808_s4] sm:$0xf]  ;;  %v2503_v2 = vsub.f32 %v2336_v7, %v464_v9  ;;  %v548_v5 = vand.u32 4294901760, %v2485_v59  ;;  %v555_v3 = vand.u32 4294901760, %v2490_v60  ;;  %s372_s22 = scalar_lea.vmem [#allocation7], %s2683_s25  ;;  %s2703_s30 = scalar_lea.sflag [#allocation9], %s1109_s26 }
  0x62   : > { %1759 = vmatprep.subr.bf16.mxu0 %v2139_v0  ;;  %1687 = vmatprep.subr.bf16.mxu1 %v2139_v0  ;;  %v2457_v46 = vpack.c.bf16 %v494_v39, %v491_v38  ;;  %v2471_v52 = vpack.c.bf16 %v500_v48, %v497_v47  ;;  %v2510_v25 = vsub.f32 %v2340_v10, %v467_v14  ;;  %s1987_s11 = scalar_lea.vmem %s2698_s20, 64  ;;  %p2832_p11 = scmp.ne.s32.totalorder %s2822_s15, 0 }
  0x63   : > { %v432_v55 = vmul.f32 %v430_v51, %v430_v51  ;;  %v2515_v4 = vsub.f32 %v2342_v11, %v470_v15  ;;  %v549_v7 = vsub.f32 %v2485_v59, %v548_v5  ;;  %v556_v9 = vsub.f32 %v2490_v60, %v555_v3  ;;  %p1988_p13 = scmp.ne.s32.totalorder %s2698_s20, %s1987_s11  ;;  %s2142_s13 = smov [#allocation8]  }
  0x64   : > { %v2529_v10 = vsub.f32 %v2366_v16, %v473_v21  ;;  %v2534_v11 = vsub.f32 %v2368_v17, %v476_v22  ;;  %v1778_v15 = vpack.c.bf16 %v555_v3, %v548_v5  ;;  %v2548_v17 = vsub.f32 %v2389_v23, %v479_v27  ;;  %s1991_s21 = sshll.u32 %s2142_s13, 4  ;;  %s1992_s21 = int_to_ptr.vmem [resolvable:$false] %s1991_s21 }
  0x65   : > { %1761 = vmatpush3.bf16.msra.mxu0 %v2383_v20  ;;  %1689 = vmatpush3.bf16.msra.mxu1 %v2383_v20  ;;  %v550_v51 = vand.u32 4294901760, %v549_v7  ;;  %v2553_v22 = vsub.f32 %v2391_v24, %v482_v28  ;;  %v2566_v28 = vsub.f32 %v2407_v29, %v485_v32  ;;  %v2587_v32 = vsub.f32 %v2425_v35, %v494_v39  ;;  %p1989_p2 = pnand %p1988_p13, %p2832_p11  ;;  %s1993_s9 = scalar_lea.vmem %s1992_s21, 128 }
  0x66   : > { %1762 = vmatprep.subr.bf16.mxu0 %v2139_v0  ;;  %1690 = vmatprep.subr.bf16.mxu1 %v2139_v0  ;;  %v2600_v35 = vsub.f32 %v2439_v41, %v497_v47  ;;  %v2605_v39 = vsub.f32 %v2441_v42, %v500_v48  ;;  %p1994_p5 = scmp.lt.s32.totalorder %s2698_s20, %s1992_s21  ;;  %p1995_p6 = scmp.lt.s32.totalorder %s1993_s9, %s1987_s11 }
  0x67   : > { %v611_v29 = vand.u32 4294901760, %v2553_v22  ;;  %v639_v41 = vand.u32 4294901760, %v2587_v32  ;;  %p1990_p3 = pneg %p1989_p2 }
  0x68   : > { %p1996_p7 = por %p1995_p6, %p1994_p5 }
  0x69   : > { %1764 = vmatpush3.bf16.msra.mxu0 %v2401_v26  ;;  %1692 = vmatpush3.bf16.msra.mxu1 %v2401_v26  ;;  %v1926_v40 = vpop.eup %1925 }
  0x6a   : > { %1765 = vmatprep.subr.bf16.mxu0 %v2139_v0  ;;  %1693 = vmatprep.subr.bf16.mxu1 %v2139_v0  ;;  %v413_v43 = vmul.f32 %v1926_v40, %v412_v36  ;;  %v562_v36 = vand.u32 4294901760, %v2498_v63  ;;  %p1997_p9 = pnand %p1996_p7, %p1990_p3 }
  0x6c   : > { %v414_v49 = vmul.f32 %v1926_v40, %v413_v43 }
  0x6d   : > { %1767 = vmatpush3.bf16.msra.mxu0 %v2417_v31  ;;  %1695 = vmatpush3.bf16.msra.mxu1 %v2417_v31 }
  0x6e   : > { %1768 = vmatprep.subr.bf16.mxu0 %v2139_v0  ;;  %1696 = vmatprep.subr.bf16.mxu1 %v2139_v0  ;;  %v415_v50 = vsub.f32 1.5, %v414_v49  ;;  %v576_v49 = vand.u32 4294901760, %v2510_v25 }
  0x70   : > { %v416_v53 = vmul.f32 %v1926_v40, %v415_v50  ;;  %v569_v40 = vand.u32 4294901760, %v2503_v2  ;;  %v583_v50 = vand.u32 4294901760, %v2515_v4 }
  0x71   : > { %1770 = vmatpush3.bf16.msra.mxu0 %v2433_v37  ;;  %1698 = vmatpush3.bf16.msra.mxu1 %v2433_v37 }
  0x72   : > { %1771 = vmatprep.subr.bf16.mxu0 %v2139_v0  ;;  %1699 = vmatprep.subr.bf16.mxu1 %v2139_v0  ;;  %v2475_v54 = vmul.f32 %v416_v53, %v416_v53  ;;  %v431_v62 = vmul.f32 %v416_v53, %v405_v61  ;;  %v557_v53 = vand.u32 4294901760, %v556_v9  ;;  %v570_v16 = vsub.f32 %v2503_v2, %v569_v40 }
  0x73   : > { %v577_v61 = vsub.f32 %v2510_v25, %v576_v49  ;;  %v584_v27 = vsub.f32 %v2515_v4, %v583_v50  ;;  %v1784_v7 = vpack.c.bf16 %v583_v50, %v576_v49  ;;  %v618_v50 = vand.u32 4294901760, %v2566_v28 }
  0x74   : > { %v433_v56 = vmul.f32 -0.5, %v2475_v54  ;;  %v1706_v5 = vpack.c.bf16 %v557_v53, %v550_v51  ;;  %v571_v23 = vand.u32 4294901760, %v570_v16  ;;  %v604_v53 = vand.u32 4294901760, %v2548_v17 }
  0x75   : > { %1773 = vmatpush3.bf16.msra.mxu0 %v2457_v46  ;;  %1701 = vmatpush3.bf16.msra.mxu1 %v2457_v46  ;;  %v578_v9 = vand.u32 4294901760, %v577_v61  ;;  %v585_v51 = vand.u32 4294901760, %v584_v27 }
  0x76   : > { %1774 = vmatprep.subr.bf16.mxu0 %v2139_v0  ;;  %1702 = vmatprep.subr.bf16.mxu1 %v2139_v0  ;;  %v434_v57 = vmul.f32 %v433_v56, %v432_v55  ;;  %v563_v55 = vsub.f32 %v2498_v63, %v562_v36  ;;  %v590_v56 = vand.u32 4294901760, %v2529_v10 }
  0x77   : > { %v1712_v16 = vpack.c.bf16 %v585_v51, %v578_v9  ;;  %v653_v9 = vand.u32 4294901760, %v2605_v39 }
  0x78   : > { %v435_v58 = vmul.f32 1.442695, %v434_v57  ;;  %v564_v3 = vand.u32 4294901760, %v563_v55 }
  0x79   : > { %1776 = vmatpush3.bf16.msra.mxu0 %v2471_v52  ;;  %1704 = vmatpush3.bf16.msra.mxu1 %v2471_v52 }
  0x7a   : > { %1777 = vmatprep.subr.bf16.mxu0 %v2139_v0  ;;  %1705 = vmatprep.subr.bf16.mxu1 %v2139_v0  ;;  %1927 = vpow2.f32 %v435_v58  ;;  %v1781_v58 = vpack.c.bf16 %v569_v40, %v562_v36  ;;  %v591_v36 = vsub.f32 %v2529_v10, %v590_v56 }
  0x7c   : > { %v592_v49 = vand.u32 4294901760, %v591_v36 }
  0x84   : > { %v1928_v6 = vpop.eup %1927 }
  0x85   : > { %v2517_v8 = vmul.f32 %v1928_v6, %v431_v62  ;;  %v597_v62 = vand.u32 4294901760, %v2534_v11  ;;  %v2571_v6 = vsub.f32 %v2409_v30, %v488_v33  ;;  %v2582_v30 = vsub.f32 %v2423_v34, %v491_v38 }
  0x86   : > { %v605_v34 = vsub.f32 %v2548_v17, %v604_v53  ;;  %v612_v38 = vsub.f32 %v2553_v22, %v611_v29 }
  0x87   : > { %v2524_v43 = vand.u32 4294901760, %v2517_v8  ;;  %v598_v40 = vsub.f32 %v2534_v11, %v597_v62  ;;  %v1787_v33 = vpack.c.bf16 %v597_v62, %v590_v56  ;;  %v625_v55 = vand.u32 4294901760, %v2571_v6 }
  0x88   : > { %v1790_v56 = vpack.c.bf16 %v611_v29, %v604_v53  ;;  %v632_v61 = vand.u32 4294901760, %v2582_v30  ;;  %v654_v29 = vsub.f32 %v2605_v39, %v653_v9 }
  0x89   : > { %v2538_v14 = vsub.f32 %v2517_v8, %v2524_v43  ;;  %v1793_v42 = vpack.c.bf16 %v625_v55, %v618_v50 }
  0x8a   : > { %v1796_v36 = vpack.c.bf16 %v639_v41, %v632_v61 }
  0x8b   : > { %v537_v21 = vand.u32 4294901760, %v2538_v14 }
  0x8d   : > { %1609 = vmatmul.mubr.f32.vlgmr.msra.gmra.mrb[0].mxu0 %v537_v21  ;;  %v538_v57 = vsub.f32 %v2538_v14, %v537_v21  ;;  %v599_v21 = vand.u32 4294901760, %v598_v40 }
  0x8e   : > { %1779 = vmatpush3.bf16.msra.mxu0 %v1778_v15  ;;  %1643 = vmatprep.mubr.msk.f32.mxu0 %vm2140_vm0, %v2141_v1  ;;  %v1709_v15 = vpack.c.bf16 %v571_v23, %v564_v3  ;;  %v613_v3 = vand.u32 4294901760, %v612_v38  ;;  %v633_v23 = vsub.f32 %v2582_v30, %v632_v61 }
  0x8f   : > { %1780 = vmatprep.subr.bf16.mxu0 %v2139_v0  ;;  %v539_v24 = vand.u32 4294901760, %v538_v57  ;;  %v619_v57 = vsub.f32 %v2566_v28, %v618_v50  ;;  %v1715_v62 = vpack.c.bf16 %v599_v21, %v592_v49  ;;  %v1730_v21 = vpack.c.bf16 %v2490_v60, %v2485_v59 }
  0x90   : > { %v634_v40 = vand.u32 4294901760, %v633_v23 }
  0x91   : > { %1504 = vmatmul.mubr.f32.vlgmr.msra.gmra.mrb[0].mxu1 %v539_v24  ;;  %v620_v47 = vand.u32 4294901760, %v619_v57  ;;  %v640_v24 = vsub.f32 %v2587_v32, %v639_v41 }
  0x92   : > { %1707 = vmatpush3.bf16.msra.mxu1 %v1706_v5  ;;  %1782 = vmatpush3.bf16.msra.mxu0 %v1781_v58  ;;  %v626_v58 = vsub.f32 %v2571_v6, %v625_v55  ;;  %v606_v5 = vand.u32 4294901760, %v605_v34  ;;  %v655_v55 = vand.u32 4294901760, %v654_v29  ;;  %v1733_v34 = vpack.c.bf16 %v2503_v2, %v2498_v63 }
  0x93   : > { %1708 = vmatprep.subr.bf16.mxu1 %v2139_v0  ;;  %1783 = vmatprep.subr.bf16.mxu0 %v2139_v0  ;;  %v641_v51 = vand.u32 4294901760, %v640_v24 }
  0x94   : > { %1538 = vmatprep.mubr.msk.f32.mxu1 %vm2140_vm0, %v2141_v1  ;;  %v627_v48 = vand.u32 4294901760, %v626_v58  ;;  %v1718_v27 = vpack.c.bf16 %v613_v3, %v606_v5 }
  0x96   : > { %1710 = vmatpush3.bf16.msra.mxu1 %v1709_v15  ;;  %1785 = vmatpush3.bf16.msra.mxu0 %v1784_v7  ;;  %v646_v7 = vand.u32 4294901760, %v2600_v35  ;;  %v1721_v15 = vpack.c.bf16 %v627_v48, %v620_v47 }
  0x97   : > { %1711 = vmatprep.subr.bf16.mxu1 %v2139_v0  ;;  %1786 = vmatprep.subr.bf16.mxu0 %v2139_v0 }
  0x98   : > { %v647_v53 = vsub.f32 %v2600_v35, %v646_v7  ;;  %v1799_v49 = vpack.c.bf16 %v653_v9, %v646_v7 }
  0x9a   : > { %1713 = vmatpush3.bf16.msra.mxu1 %v1712_v16  ;;  %1788 = vmatpush3.bf16.msra.mxu0 %v1787_v33  ;;  %v1724_v33 = vpack.c.bf16 %v641_v51, %v634_v40  ;;  %v648_v50 = vand.u32 4294901760, %v647_v53 }
  0x9b   : > { %1714 = vmatprep.subr.bf16.mxu1 %v2139_v0  ;;  %1789 = vmatprep.subr.bf16.mxu0 %v2139_v0 }
  0x9c   : > { %v1727_v16 = vpack.c.bf16 %v655_v55, %v648_v50 }
  0x9e   : > { %1716 = vmatpush3.bf16.msra.mxu1 %v1715_v62  ;;  %1791 = vmatpush3.bf16.msra.mxu0 %v1790_v56 }
  0x9f   : > { %1717 = vmatprep.subr.bf16.mxu1 %v2139_v0  ;;  %1792 = vmatprep.subr.bf16.mxu0 %v2139_v0 }
  0xa2   : > { %1719 = vmatpush3.bf16.msra.mxu1 %v1718_v27  ;;  %1794 = vmatpush3.bf16.msra.mxu0 %v1793_v42 }
  0xa3   : > { %1720 = vmatprep.subr.bf16.mxu1 %v2139_v0  ;;  %1795 = vmatprep.subr.bf16.mxu0 %v2139_v0 }
  0xa6   : > { %1722 = vmatpush3.bf16.msra.mxu1 %v1721_v15  ;;  %1797 = vmatpush3.bf16.msra.mxu0 %v1796_v36 }
  0xa7   : > { %1723 = vmatprep.subr.bf16.mxu1 %v2139_v0  ;;  %1798 = vmatprep.subr.bf16.mxu0 %v2139_v0 }
  0xaa   : > { %1725 = vmatpush3.bf16.msra.mxu1 %v1724_v33  ;;  %1800 = vmatpush3.bf16.msra.mxu0 %v1799_v49 }
  0xab   : > { %1726 = vmatprep.subr.bf16.mxu1 %v2139_v0  ;;  %1801 = vmatprep.subr.bf16.mxu0 %v2139_v0 }
  0xad   : > { %1644 = vmatmul.mubr.f32.vlgmr.msra.gmra.mrb[0].mxu0 %v2524_v43 }
  0xae   : > { %1728 = vmatpush3.bf16.msra.mxu1 %v1727_v16  ;;  %1803 = vmatpush3.bf16.msra.mxu0 %v2348_v12  ;;  %v1736_v12 = vpack.c.bf16 %v2515_v4, %v2510_v25 }
  0xaf   : > { %1729 = vmatprep.subr.bf16.mxu1 %v2139_v0  ;;  %1804 = vmatprep.subr.bf16.mxu0 %v2139_v0 }
  0xb0   : > { %1678 = vmatprep.mubr.msk.f32.mxu0 %vm2140_vm0, %v2141_v1 }
  0xb1   : > { %1539 = vmatmul.mubr.f32.vlgmr.msra.gmra.mrb[0].mxu1 %v2524_v43 }
  0xb2   : > { %1731 = vmatpush3.bf16.msra.mxu1 %v1730_v21  ;;  %1806 = vmatpush3.bf16.msra.mxu0 %v2360_v13  ;;  %v1739_v13 = vpack.c.bf16 %v2534_v11, %v2529_v10 }
  0xb3   : > { %1732 = vmatprep.subr.bf16.mxu1 %v2139_v0  ;;  %1807 = vmatprep.subr.bf16.mxu0 %v2139_v0 }
  0xb4   : > { %1573 = vmatprep.mubr.msk.f32.mxu1 %vm2140_vm0, %v2141_v1  ;;  %v1742_v1 = vpack.c.bf16 %v2553_v22, %v2548_v17 }
  0xb6   : > { %1734 = vmatpush3.bf16.msra.mxu1 %v1733_v34  ;;  %1809 = vmatpush3.bf16.msra.mxu0 %v2383_v20  ;;  %v1745_v20 = vpack.c.bf16 %v2571_v6, %v2566_v28 }
  0xb7   : > { %1735 = vmatprep.subr.bf16.mxu1 %v2139_v0  ;;  %1810 = vmatprep.subr.bf16.mxu0 %v2139_v0 }
  0xba   : > { %1737 = vmatpush3.bf16.msra.mxu1 %v1736_v12  ;;  %1812 = vmatpush3.bf16.msra.mxu0 %v2401_v26  ;;  %v1748_v26 = vpack.c.bf16 %v2587_v32, %v2582_v30 }
  0xbb   : > { %1738 = vmatprep.subr.bf16.mxu1 %v2139_v0  ;;  %1813 = vmatprep.subr.bf16.mxu0 %v2139_v0 }
  0xbe   : > { %1740 = vmatpush3.bf16.msra.mxu1 %v1739_v13  ;;  %1815 = vmatpush3.bf16.msra.mxu0 %v2417_v31  ;;  %v1751_v31 = vpack.c.bf16 %v2605_v39, %v2600_v35 }
  0xbf   : > { %1741 = vmatprep.subr.bf16.mxu1 %v2139_v0  ;;  %1816 = vmatprep.subr.bf16.mxu0 %v2139_v0 }
  0xc2   : > { %1743 = vmatpush3.bf16.msra.mxu1 %v1742_v1  ;;  %1818 = vmatpush3.bf16.msra.mxu0 %v2433_v37  ;;  %v422_v37 = vmul.f32 %v2444_v44, %v2375_v19 }
  0xc3   : > { %1744 = vmatprep.subr.bf16.mxu1 %v2139_v0  ;;  %1819 = vmatprep.subr.bf16.mxu0 %v2139_v0 }
  0xc6   : > { %1746 = vmatpush3.bf16.msra.mxu1 %v1745_v20  ;;  %1821 = vmatpush3.bf16.msra.mxu0 %v2457_v46  ;;  %v423_v46 = vmul.f32 %v2370_v18, %v2449_v45 }
  0xc7   : > { %1747 = vmatprep.subr.bf16.mxu1 %v2139_v0  ;;  %1822 = vmatprep.subr.bf16.mxu0 %v2139_v0 }
  0xca   : > { %1749 = vmatpush3.bf16.msra.mxu1 %v1748_v26  ;;  %1824 = vmatpush3.bf16.msra.mxu0 %v2471_v52  ;;  %v427_v52 = vmul.f32 %v2370_v18, %v2375_v19 }
  0xcb   : > { %1750 = vmatprep.subr.bf16.mxu1 %v2139_v0  ;;  %v424_v0 = vadd.f32 %v423_v46, %v422_v37 }
  0xcc   : > { %v428_v59 = vmul.f32 %v427_v52, %v2475_v54 }
  0xcd   : > { %1679 = vmatmul.mubr.f32.vlgmr.msra.gmra.mrb[0].mxu0 %v2524_v43  ;;  %v425_v44 = vmul.f32 %v424_v0, %v2475_v54 }
  0xce   : > { %1752 = vmatpush3.bf16.msra.mxu1 %v1751_v31  ;;  %429 = vst [vmem:[%s379_s23] sm:$0xf] %v428_v59 }
  0xcf   : > { %426 = vst [vmem:[%s372_s22] sm:$0xf] %v425_v44 }
  0xd1   : > { %1574 = vmatmul.mubr.f32.vlgmr.msra.gmra.mrb[0].mxu1 %v2538_v14 }
  0xd2   : > { %2000 = shalt.err (!%p1997_p9)
}
  0xd3   : > { %s2001_s26 = scalar_lea.hbm %s2696_s16, 64  ;;  %s2005_s14 = scalar_lea.hbm %s2811_s7, 128 }
  0xd4   : > { %p2002_p12 = scmp.ne.s32.totalorder %s2696_s16, %s2001_s26  ;;  %p2006_p8 = scmp.lt.u32.totalorder %s2696_s16, %s2811_s7 }
  0xd5   : > { %p2007_p4 = scmp.lt.u32.totalorder %s2005_s14, %s2001_s26  ;;  %p2009_p13 = scmp.lt.u32.totalorder %s2001_s26, %s2696_s16 }
  0xd6   : > { %p2003_p0 = pnand %p2002_p12, %p2832_p11 }
  0xd7   : > { %p2008_p10 = por %p2007_p4, %p2006_p8 }
  0xd8   : > { %p2004_p1 = pneg %p2003_p0 }
  0xd9   : > { %p2010_p2 = por %p2009_p13, %p2008_p10 }
  0xdb   : > { %p2011_p3 = pnand %p2010_p2, %p2004_p1 }
  0xdd   : > { %2014 = shalt.err (!%p2011_p3)
}
  0xde   : > { %1843 = dma.vmem_to_hbm [thread:$0]  (%p2832_p11), %s2698_s20, 64, %s2696_s16, %s2703_s30  }
  0xdf   : > { %s2731_s23 = scalar_lea.hbm %s2810_s6, %s2688_s19  ;;  %s1129_s26 = sshll.u32 %s372_s22, 4  ;;  %s1130_s26 = int_to_ptr.vmem [resolvable:$true] %s1129_s26 }
  0xe0   : > { %s1105_s24 = scalar_lea.sflag [#allocation4], %s370_s12  ;;  %s2015_s14 = scalar_lea.vmem %s1130_s26, 64 }
  0xe1   : > { %p2016_p5 = scmp.ne.s32.totalorder %s1130_s26, %s2015_s14  ;;  %s2143_s13 = smov [#allocation7]  }
  0xe2   : > { %s2019_s21 = sshll.u32 %s2143_s13, 4  ;;  %s2020_s21 = int_to_ptr.vmem [resolvable:$false] %s2019_s21 }
  0xe3   : > { %p2017_p6 = pnand %p2016_p5, %p2832_p11  ;;  %s2021_s0 = scalar_lea.vmem %s2020_s21, 128 }
  0xe4   : > { %p2022_p9 = scmp.lt.s32.totalorder %s1130_s26, %s2020_s21  ;;  %p2023_p12 = scmp.lt.s32.totalorder %s2021_s0, %s2015_s14 }
  0xe5   : > { %p2018_p7 = pneg %p2017_p6 }
  0xe6   : > { %p2024_p0 = por %p2023_p12, %p2022_p9 }
  0xe8   : > { %p2025_p1 = pnand %p2024_p0, %p2018_p7 }
  0xea   : > { %2028 = shalt.err (!%p2025_p1)
}
  0xeb   : > { %s2029_s12 = scalar_lea.hbm %s2731_s23, 64  ;;  %s2033_s22 = scalar_lea.hbm %s2810_s6, 128 }
  0xec   : > { %p2030_p8 = scmp.ne.s32.totalorder %s2731_s23, %s2029_s12  ;;  %p2034_p13 = scmp.lt.u32.totalorder %s2731_s23, %s2810_s6 }
  0xed   : > { %p2035_p2 = scmp.lt.u32.totalorder %s2033_s22, %s2029_s12  ;;  %p2037_p5 = scmp.lt.u32.totalorder %s2029_s12, %s2731_s23 }
  0xee   : > { %p2031_p4 = pnand %p2030_p8, %p2832_p11 }
  0xef   : > { %p2036_p3 = por %p2035_p2, %p2034_p13 }
  0xf0   : > { %p2032_p10 = pneg %p2031_p4 }
  0xf1   : > { %p2038_p6 = por %p2037_p5, %p2036_p3 }
  0xf3   : > { %p2039_p7 = pnand %p2038_p6, %p2032_p10 }
  0xf5   : > { %2042 = shalt.err (!%p2039_p7)
}
  0xf6   : > { %1842 = dma.vmem_to_hbm [thread:$0]  (%p2832_p11), %s1130_s26, 64, %s2731_s23, %s1105_s24  }
  0xf7   : > { %s386_s0 = scalar_lea.vmem [#allocation10], %s2683_s25  ;;  %s2760_s24 = scalar_lea.hbm %s2812_s8, %s2688_s19 }
  0xf8   : > { %s1157_s14 = sshll.u32 %s386_s0, 4  ;;  %s2144_s21 = smov [#allocation10]   ;;  %s1158_s14 = int_to_ptr.vmem [resolvable:$true] %s1157_s14 }
  0xf9   : > { %s2043_s13 = scalar_lea.vmem %s1158_s14, 64  ;;  %s2047_s12 = sshll.u32 %s2144_s21, 4  ;;  %s2048_s12 = int_to_ptr.vmem [resolvable:$false] %s2047_s12 }
  0xfa   : > { %p2044_p9 = scmp.ne.s32.totalorder %s1158_s14, %s2043_s13  ;;  %s2049_s25 = scalar_lea.vmem %s2048_s12, 128 }
  0xfb   : > { %p2050_p1 = scmp.lt.s32.totalorder %s1158_s14, %s2048_s12  ;;  %p2051_p8 = scmp.lt.s32.totalorder %s2049_s25, %s2043_s13 }
  0xfc   : > { %p2045_p12 = pnand %p2044_p9, %p2832_p11 }
  0xfd   : > { %p2052_p4 = por %p2051_p8, %p2050_p1 }
  0xfe   : > { %p2046_p0 = pneg %p2045_p12 }
 0x100   : > { %p2053_p10 = pnand %p2052_p4, %p2046_p0 }
 0x1a0   : > { %v1091_v18 = vpop.f32.mrb[0].mxu0 }
 0x1a1   : > { %v1680_v19 = vpop.f32.mrb[1].mxu0 }
 0x1a4   : > { %v796_v45 = vpop.f32.mrb[0].mxu1 }
 0x1a5   : > { %v1825_v54 = vadd.f32 %v1091_v18, %v796_v45  ;;  %v1575_v60 = vpop.f32.mrb[1].mxu1 }
 0x1a7   : > { %1929 = vrcp.f32 %v1825_v54 }
 0x1b1   : > { %v1930_v63 = vpop.eup %1929 }
 0x1b2   : > { %v1096_v2 = vmul.f32 %v1930_v63, %v1825_v54 }
 0x1b4   : > { %v1097_v25 = vsub.f32 2.0, %v1096_v2 }
 0x1b6   : > { %v1098_v4 = vmul.f32 %v1930_v63, %v1097_v25 }
 0x1b8   : > { %v1099_v43 = vmul.f32 %v1825_v54, %v1098_v4 }
 0x1ba   : > { %v1100_v10 = vsub.f32 2.0, %v1099_v43 }
 0x1bc   : > { %v1101_v11 = vmul.f32 %v1100_v10, %v1098_v4 }
 0x1be   : > { %v1102_v14 = vmul.f32 %v1101_v11, %v2517_v8 }
 0x1c0   : > { %1103 = vst [vmem:[%s386_s0] sm:$0xf] %v1102_v14 }
 0x1c1   : > { %2056 = shalt.err (!%p2053_p10)
}
 0x1c2   : > { %s2057_s19 = scalar_lea.hbm %s2760_s24, 64  ;;  %s2061_s22 = scalar_lea.hbm %s2812_s8, 128 }
 0x1c3   : > { %p2058_p13 = scmp.ne.s32.totalorder %s2760_s24, %s2057_s19  ;;  %p2062_p5 = scmp.lt.u32.totalorder %s2760_s24, %s2812_s8 }
 0x1c4   : > { %p2063_p6 = scmp.lt.u32.totalorder %s2061_s22, %s2057_s19  ;;  %p2065_p9 = scmp.lt.u32.totalorder %s2057_s19, %s2760_s24 }
 0x1c5   : > { %p2059_p2 = pnand %p2058_p13, %p2832_p11 }
 0x1c6   : > { %p2064_p7 = por %p2063_p6, %p2062_p5 }
 0x1c7   : > { %p2060_p3 = pneg %p2059_p2 }
 0x1c8   : > { %p2066_p12 = por %p2065_p9, %p2064_p7 }
 0x1ca   : > { %p2067_p0 = pnand %p2066_p12, %p2060_p3 }
 0x1cc   : > { %2070 = shalt.err (!%p2067_p0)
}
 0x1cd   : > { %1844 = dma.vmem_to_hbm [thread:$0]  (%p2832_p11), %s1158_s14, 64, %s2760_s24, %s2703_s30  }
 0x1ce PF: > { %p1869_p1 = scmp.ge.s32.totalorder %s2133_s10, 2  ;;  %s1169_s0 = sand.u32 1, %s2113_s27  }
 0x1cf   : > { %p2833_p8 = scmp.ne.s32.totalorder %s2823_s17, 0  ;;  %s1170_s23 = scalar_lea.sflag [#allocation4], %s1169_s0 }
 0x1d1   : > { %p1856_p4 = pnand %p1869_p1, %p2833_p8 }
 0x1d3   : > { %2104 = dma.done.wait (!%p1856_p4), %s1170_s23, 64  }
 0x1d4   : > { %2106 = vsyncadd (!%p1856_p4), %s1170_s23, 4294967232  ;;  %s2834_s26 = sadd.s32 4294967294, %s2133_s10  }
 0x1d5   : > { %s1178_s13 = sand.u32 1, %s2834_s26  }
 0x1d6   : > { %s1179_s21 = scalar_lea.sflag [#allocation9], %s1178_s13 }
 0x1d7   : > { %2108 = dma.done.wait (!%p1856_p4), %s1179_s21, 128  }
 0x1d8   : > { %2110 = vsyncadd (!%p1856_p4), %s1179_s21, 4294967168  ;;  %s27_s10 = sadd.s32 1, %s2133_s10   ;;  %s2835_s30 = sld [smem:[#allocation15_spill]] }
 0x1d9   : > { %p24_p11 = scmp.ge.s32.totalorder %s27_s10, 4   ;;  %s2836_s9 = sld [smem:[#allocation16_spill]] }
 0x1da   : > { %s2837_s27 = smov %s2117_s28  ;;  %s2838_s28 = smov %s2121_s29 }
 0x1db   : > { %s2839_s29 = smov %s2248_s18  ;;  %26 = sbr.rel (!%p24_p11) target bundleno = 10 (0xa), region = 128 }
 0x1e2   :  { %1193 = vsyncpa [#allocation3], 1 }
 0x1e3   :  { %1195 = vsyncpa [#allocation3 + $0x1], 1 }
 0x1e4   :  { %1196 = vsyncpa [#allocation6], 1 }
 0x1e5   :  { %1197 = vsyncpa [#allocation4], 1 }
 0x1e6   :  { %1199 = vsyncpa [#allocation4 + $0x1], 1 }
 0x1e7   :  { %1200 = vsyncpa [#allocation9], 1 }
 0x1e8   :  { %1202 = vsyncpa [#allocation9 + $0x1], 1 }

</bundles_post_ra>
